<compile_context>
chip_gen: v7x
topology: tpu7x:2x2x1
jax: 0.10.0
libtpu: 0.0.40
codegen_flags: <defaults>
</compile_context>

<pallas_src>
import functools
import math

import jax
import jax.numpy as jnp
from jax.experimental import pallas as pl
from jax.experimental.pallas import tpu as pltpu

# Large finite "minus infinity": avoids exp(-inf - (-inf)) = NaN if the kernel
# is ever extended with padding masks; exp(-1e30 - m) underflows to exactly 0.
_NEG_BIG = -1e30

_VMEM_LIMIT = 32 * 1024 * 1024  # explicit scoped-VMEM budget, safe on v5e/v6e/v7x


def _pick_tile(n, candidates=(256, 128, 64, 32, 16, 8)):
    """Largest candidate tile that divides n; fall back to the full dim
    (a block equal to the full array dim is always legal)."""
    for t in candidates:
        if t <= n and n % t == 0:
            return t
    return n


# ----------------------------------------------------------------------------
# 1) Fused QKV projection (q pre-scaled by 1/sqrt(head_dim))
# ----------------------------------------------------------------------------
def _qkv_proj_kernel(x_ref, wqkv_ref, q_ref, k_ref, v_ref, *, d_out, q_scale):
    qkv = jnp.dot(x_ref[...], wqkv_ref[...],
                  preferred_element_type=jnp.float32)          # (tm, 3*d_out)
    q_ref[...] = (qkv[:, :d_out] * q_scale).astype(q_ref.dtype)
    k_ref[...] = qkv[:, d_out:2 * d_out].astype(k_ref.dtype)
    v_ref[...] = qkv[:, 2 * d_out:3 * d_out].astype(v_ref.dtype)


# ----------------------------------------------------------------------------
# 2) Flash attention with online softmax (causal)
# ----------------------------------------------------------------------------
def _flash_attn_kernel(q_ref, k_ref, v_ref, o_ref, m_ref, l_ref, acc_ref,
                       *, tq, tk):
    qi = pl.program_id(1)
    ki = pl.program_id(2)

    @pl.when(ki == 0)
    def _init():
        m_ref[...] = jnp.full_like(m_ref, _NEG_BIG)
        l_ref[...] = jnp.zeros_like(l_ref)
        acc_ref[...] = jnp.zeros_like(acc_ref)

    q_start = qi * tq
    k_start = ki * tk

    # Causal: kv tiles entirely above the diagonal contribute nothing -> skip.
    @pl.when(k_start <= q_start + (tq - 1))
    def _compute():
        q = q_ref[...]                                         # (tq, hd), scaled
        k = k_ref[...]                                         # (tk, hd)
        # scores = q @ k^T without materializing the transpose.
        s = jax.lax.dot_general(q, k, (((1,), (1,)), ((), ())),
                                preferred_element_type=jnp.float32)  # (tq, tk)

        row = q_start + jax.lax.broadcasted_iota(jnp.int32, (tq, tk), 0)
        col = k_start + jax.lax.broadcasted_iota(jnp.int32, (tq, tk), 1)
        s = jnp.where(col > row, _NEG_BIG, s)

        m_prev = m_ref[...]                                    # (tq, 1)
        m_new = jnp.maximum(m_prev, jnp.max(s, axis=-1, keepdims=True))
        alpha = jnp.exp(m_prev - m_new)
        p = jnp.exp(s - m_new)                                 # un-normalized
        l_ref[...] = alpha * l_ref[...] + jnp.sum(p, axis=-1, keepdims=True)
        acc_ref[...] = alpha * acc_ref[...] + jnp.dot(
            p.astype(v_ref.dtype), v_ref[...],
            preferred_element_type=jnp.float32)
        m_ref[...] = m_new

    @pl.when(ki == pl.num_programs(2) - 1)
    def _finalize():
        # Deferred normalization: one reciprocal on (tq, 1), applied to the
        # (tq, hd) accumulator instead of dividing the (tq, tk) score tile.
        o_ref[...] = (acc_ref[...] * pl.reciprocal(l_ref[...])).astype(o_ref.dtype)


# ----------------------------------------------------------------------------
# 3) Output projection (with bias)
# ----------------------------------------------------------------------------
def _out_proj_kernel(ctx_ref, wo_ref, bo_ref, o_ref):
    out = jnp.dot(ctx_ref[...], wo_ref[...], preferred_element_type=jnp.float32)
    o_ref[...] = (out + bo_ref[...]).astype(o_ref.dtype)


# ----------------------------------------------------------------------------
# Wrapper
# ----------------------------------------------------------------------------
def multi_head_attention(x, wq, wk, wv, wo, bo, *, num_heads):
    B, T, d_in = x.shape
    d_out = wq.shape[1]
    assert d_out % num_heads == 0
    head_dim = d_out // num_heads
    N = B * T
    dtype = x.dtype

    # --- layout plumbing (no compute) ---------------------------------------
    x2d = x.reshape(N, d_in)
    wqkv = jnp.concatenate([wq, wk, wv], axis=1)               # (d_in, 3*d_out)
    bo2 = bo.reshape(1, d_out)

    tm = _pick_tile(N)        # row tile for the projection kernels
    tq = _pick_tile(T)        # query tile
    tk = _pick_tile(T)        # key/value tile

    row_params = pltpu.CompilerParams(
        dimension_semantics=("parallel",),
        vmem_limit_bytes=_VMEM_LIMIT)

    # --- 1) fused QKV projection ---------------------------------------------
    q2d, k2d, v2d = pl.pallas_call(
        functools.partial(_qkv_proj_kernel, d_out=d_out,
                          q_scale=1.0 / math.sqrt(head_dim)),
        out_shape=(jax.ShapeDtypeStruct((N, d_out), dtype),) * 3,
        grid=(N // tm,),
        in_specs=[
            pl.BlockSpec((tm, d_in), lambda i: (i, 0)),
            pl.BlockSpec((d_in, 3 * d_out), lambda i: (0, 0)),  # weight resident
        ],
        out_specs=(pl.BlockSpec((tm, d_out), lambda i: (i, 0)),) * 3,
        compiler_params=row_params,
    )(x2d, wqkv)

    # --- split heads: (N, d_out) -> (B*H, T, head_dim)  (layout plumbing) ----
    def split_heads(a2d):
        return (a2d.reshape(B, T, num_heads, head_dim)
                   .transpose(0, 2, 1, 3)
                   .reshape(B * num_heads, T, head_dim))

    qh, kh, vh = split_heads(q2d), split_heads(k2d), split_heads(v2d)
    BH = B * num_heads

    # --- 2) flash attention ----------------------------------------------------
    ctx_h = pl.pallas_call(
        functools.partial(_flash_attn_kernel, tq=tq, tk=tk),
        out_shape=jax.ShapeDtypeStruct((BH, T, head_dim), dtype),
        grid=(BH, T // tq, T // tk),
        in_specs=[
            pl.BlockSpec((None, tq, head_dim), lambda bh, qi, ki: (bh, qi, 0)),
            pl.BlockSpec((None, tk, head_dim), lambda bh, qi, ki: (bh, ki, 0)),
            pl.BlockSpec((None, tk, head_dim), lambda bh, qi, ki: (bh, ki, 0)),
        ],
        out_specs=pl.BlockSpec((None, tq, head_dim),
                               lambda bh, qi, ki: (bh, qi, 0)),
        scratch_shapes=[
            pltpu.VMEM((tq, 1), jnp.float32),          # running max  m
            pltpu.VMEM((tq, 1), jnp.float32),          # running sum  l
            pltpu.VMEM((tq, head_dim), jnp.float32),   # accumulator
        ],
        compiler_params=pltpu.CompilerParams(
            dimension_semantics=("parallel", "parallel", "arbitrary"),
            vmem_limit_bytes=_VMEM_LIMIT),
    )(qh, kh, vh)

    # --- merge heads: (B*H, T, hd) -> (N, d_out)  (layout plumbing) ----------
    ctx2d = (ctx_h.reshape(B, num_heads, T, head_dim)
                  .transpose(0, 2, 1, 3)
                  .reshape(N, d_out))

    # --- 3) output projection --------------------------------------------------
    out2d = pl.pallas_call(
        _out_proj_kernel,
        out_shape=jax.ShapeDtypeStruct((N, d_out), dtype),
        grid=(N // tm,),
        in_specs=[
            pl.BlockSpec((tm, d_out), lambda i: (i, 0)),
            pl.BlockSpec((d_out, d_out), lambda i: (0, 0)),     # weight resident
            pl.BlockSpec((1, d_out), lambda i: (0, 0)),         # bias resident
        ],
        out_specs=pl.BlockSpec((tm, d_out), lambda i: (i, 0)),
        compiler_params=row_params,
    )(ctx2d, wo, bo2)

    return out2d.reshape(B, T, d_out)


# ----------------------------------------------------------------------------
# Plain-JAX reference mirroring the PyTorch forward (eval mode)
# ----------------------------------------------------------------------------
def _reference(x, wq, wk, wv, wo, bo, *, num_heads):
    B, T, _ = x.shape
    d_out = wq.shape[1]
    hd = d_out // num_heads
    q = (x @ wq).reshape(B, T, num_heads, hd).transpose(0, 2, 1, 3)
    k = (x @ wk).reshape(B, T, num_heads, hd).transpose(0, 2, 1, 3)
    v = (x @ wv).reshape(B, T, num_heads, hd).transpose(0, 2, 1, 3)
    scores = q @ jnp.swapaxes(k, -1, -2)
    mask = jnp.triu(jnp.ones((T, T), bool), k=1)
    scores = jnp.where(mask[None, None], -jnp.inf, scores)
    w = jax.nn.softmax(scores / math.sqrt(hd), axis=-1)
    ctx = (w @ v).transpose(0, 2, 1, 3).reshape(B, T, d_out)
    return ctx @ wo + bo


if __name__ == "__main__":
    # Small shapes consistent with the module: batch=2, seq=8, d_in=32,
    # d_out=32, num_heads=4 (head_dim=8), context_length=8, dropout=0.0.
    B, T, D_IN, D_OUT, H = 2, 8, 32, 32, 4

    key = jax.random.PRNGKey(0)
    kx, kq, kk, kv, ko, kb = jax.random.split(key, 6)
    x = jax.random.normal(kx, (B, T, D_IN), jnp.float32)
    # Deterministic synthetic parameters (nn.Linear-like scale).
    scale_in = 1.0 / math.sqrt(D_IN)
    scale_out = 1.0 / math.sqrt(D_OUT)
    wq = jax.random.uniform(kq, (D_IN, D_OUT), jnp.float32, -scale_in, scale_in)
    wk = jax.random.uniform(kk, (D_IN, D_OUT), jnp.float32, -scale_in, scale_in)
    wv = jax.random.uniform(kv, (D_IN, D_OUT), jnp.float32, -scale_in, scale_in)
    wo = jax.random.uniform(ko, (D_OUT, D_OUT), jnp.float32, -scale_out, scale_out)
    bo = jax.random.uniform(kb, (D_OUT,), jnp.float32, -scale_out, scale_out)

    out = multi_head_attention(x, wq, wk, wv, wo, bo, num_heads=H)
    out = jax.block_until_ready(out)

    ref = _reference(x, wq, wk, wv, wo, bo, num_heads=H)
    assert out.shape == (B, T, D_OUT)
    assert jnp.allclose(out, ref, atol=1e-5, rtol=1e-5), "mismatch vs reference"

    print("KERNEL_OK")
</pallas_src>

<mosaic_0001>
module attributes {stable_mosaic.version = 11 : i64} {
  func.func @_qkv_proj_kernel(%arg0: i32, %arg1: memref<16x32xf32, #tpu.memory_space<vmem>>, %arg2: memref<32x96xf32, #tpu.memory_space<vmem>>, %arg3: memref<16x32xf32, #tpu.memory_space<vmem>>, %arg4: memref<16x32xf32, #tpu.memory_space<vmem>>, %arg5: memref<16x32xf32, #tpu.memory_space<vmem>>) attributes {dimension_semantics = [#tpu.dimension_semantics<parallel>], iteration_bounds = array<i64: 1>, scalar_prefetch = 0 : i64, scratch_operands = 0 : i64, tpu.core_type = #tpu.core_type<tc>, window_params = [{transform_indices = @transform_0, window_bounds = array<i64: 16, 32>}, {pipeline_mode = #tpu.pipeline_mode<synchronous>, transform_indices = @transform_1, window_bounds = array<i64: 32, 96>}, {transform_indices = @transform_2, window_bounds = array<i64: 16, 32>}, {transform_indices = @transform_3, window_bounds = array<i64: 16, 32>}, {transform_indices = @transform_4, window_bounds = array<i64: 16, 32>}]} {
    %c0 = arith.constant 0 : index
    %c0_0 = arith.constant 0 : index
    %0 = vector.load %arg1[%c0, %c0_0] : memref<16x32xf32, #tpu.memory_space<vmem>>, vector<16x32xf32>
    %c0_1 = arith.constant 0 : index
    %c0_2 = arith.constant 0 : index
    %1 = vector.load %arg2[%c0_1, %c0_2] : memref<32x96xf32, #tpu.memory_space<vmem>>, vector<32x96xf32>
    %cst = arith.constant dense<0.000000e+00> : vector<16x96xf32>
    %2 = tpu.matmul %0, %1, %cst {dimension_numbers = #tpu.dot_dimension_numbers<[1], [0], [0], [1], [0, 0, 1, 1], [], []>} : vector<16x32xf32>, vector<32x96xf32>, vector<16x96xf32> -> vector<16x96xf32>
    %3 = vector.extract_strided_slice %2 {offsets = [0, 0], sizes = [16, 32], strides = [1, 1]} : vector<16x96xf32> to vector<16x32xf32>
    %cst_3 = arith.constant 0.353553385 : f32
    %4 = vector.broadcast %cst_3 : f32 to vector<16x32xf32>
    %5 = arith.mulf %3, %4 : vector<16x32xf32>
    %c0_4 = arith.constant 0 : index
    %c0_5 = arith.constant 0 : index
    %6 = vector.load %arg3[%c0_4, %c0_5] : memref<16x32xf32, #tpu.memory_space<vmem>>, vector<16x32xf32>
    tpu.vector_store %arg3[%c0_4, %c0_5], %5 {strides = array<i32>} : memref<16x32xf32, #tpu.memory_space<vmem>>, vector<16x32xf32>,
    %7 = vector.extract_strided_slice %2 {offsets = [0, 32], sizes = [16, 32], strides = [1, 1]} : vector<16x96xf32> to vector<16x32xf32>
    %c0_6 = arith.constant 0 : index
    %c0_7 = arith.constant 0 : index
    %8 = vector.load %arg4[%c0_6, %c0_7] : memref<16x32xf32, #tpu.memory_space<vmem>>, vector<16x32xf32>
    tpu.vector_store %arg4[%c0_6, %c0_7], %7 {strides = array<i32>} : memref<16x32xf32, #tpu.memory_space<vmem>>, vector<16x32xf32>,
    %9 = vector.extract_strided_slice %2 {offsets = [0, 64], sizes = [16, 32], strides = [1, 1]} : vector<16x96xf32> to vector<16x32xf32>
    %c0_8 = arith.constant 0 : index
    %c0_9 = arith.constant 0 : index
    %10 = vector.load %arg5[%c0_8, %c0_9] : memref<16x32xf32, #tpu.memory_space<vmem>>, vector<16x32xf32>
    tpu.vector_store %arg5[%c0_8, %c0_9], %9 {strides = array<i32>} : memref<16x32xf32, #tpu.memory_space<vmem>>, vector<16x32xf32>,
    return
  }
  func.func @transform_0(%arg0: i32) -> (i32, i32) {
    %c0_i32 = arith.constant 0 : i32
    %c0_i32_0 = arith.constant 0 : i32
    return %arg0, %c0_i32 : i32, i32
  }
  func.func @transform_1(%arg0: i32) -> (i32, i32) {
    %c0_i32 = arith.constant 0 : i32
    %c0_i32_0 = arith.constant 0 : i32
    %c0_i32_1 = arith.constant 0 : i32
    return %c0_i32, %c0_i32_0 : i32, i32
  }
  func.func @transform_2(%arg0: i32) -> (i32, i32) {
    %c0_i32 = arith.constant 0 : i32
    %c0_i32_0 = arith.constant 0 : i32
    return %arg0, %c0_i32 : i32, i32
  }
  func.func @transform_3(%arg0: i32) -> (i32, i32) {
    %c0_i32 = arith.constant 0 : i32
    %c0_i32_0 = arith.constant 0 : i32
    return %arg0, %c0_i32 : i32, i32
  }
  func.func @transform_4(%arg0: i32) -> (i32, i32) {
    %c0_i32 = arith.constant 0 : i32
    %c0_i32_0 = arith.constant 0 : i32
    return %arg0, %c0_i32 : i32, i32
  }
}

</mosaic_0001>

<bundles_post_ra>
// kernel: tpu_custom_call.1
= control target key start
LH: loop header
LB: loop body
LE: loop exit
PB: predicated region body
PF: predicated region fallthrough
CT: control target
= control target key end

     0   :  { %10 = vsyncpa [#allocation3], 0  ;;  %s481_s0 = inlined_call_operand.hbm [shape: f32[16,32], index: 0, kind: input, shape index: {}]   ;;  %s482_s1 = inlined_call_operand.hbm [shape: f32[32,96], index: 1, kind: input, shape index: {}]   ;;  %s483_s2 = inlined_call_operand.hbm [shape: f32[16,32], index: 2, kind: output, shape index: {0}]   ;;  %s484_s3 = inlined_call_operand.hbm [shape: f32[16,32], index: 3, kind: output, shape index: {1}]   ;;  %s485_s4 = inlined_call_operand.hbm [shape: f32[16,32], index: 4, kind: output, shape index: {2}]  }
   0x1   :  { %11 = vsyncpa [#allocation6], 0 }
   0x2   :  { %12 = vsyncpa [#allocation4], 0 }
   0x3   :  { %13 = vsyncpa [#allocation9], 0  ;;  %s357_s15 = smov [#allocation2]   ;;  %s239_s19 = scalar_lea.hbm %s481_s0, 256 }
   0x4   :  { %s19_s16 = sshll.u32 %s357_s15, 4  ;;  %p240_p0 = scmp.ne.s32.totalorder %s481_s0, %s239_s19  ;;  %s20_s16 = int_to_ptr.vmem [resolvable:$true] %s19_s16 }
   0x5   :  { %p243_p1 = scmp.lt.u32.totalorder %s239_s19, %s481_s0 }
   0x7   :  { %p245_p2 = pnand %p243_p1, %p240_p0 }
   0x9   :  { %248 = shalt.err (!%p245_p2)
}
   0xa   :  { %s249_s24 = scalar_lea.vmem %s20_s16, 256  ;;  %p254_p4 = scmp.lt.s32.totalorder %s20_s16, %s20_s16 }
   0xb   :  { %p250_p3 = scmp.ne.s32.totalorder %s20_s16, %s249_s24  ;;  %p255_p5 = scmp.lt.s32.totalorder %s249_s24, %s249_s24 }
   0xd   :  { %p256_p6 = por %p255_p5, %p254_p4 }
   0xf   :  { %p257_p7 = pnand %p256_p6, %p250_p3 }
  0x11   :  { %260 = shalt.err (!%p257_p7)
}
  0x12   :  { %s358_s25 = smov 128   ;;  %s359_s26 = smov 8  }
  0x13   :  { %25 = dma.hbm_to_vmem [thread:$0]  %s481_s0, 256, %s20_s16, [#allocation3], %s358_s25, %s358_s25, %s359_s26  }
  0x14   :  { %s360_s29 = smov [#allocation5]   ;;  %s261_s7 = scalar_lea.hbm %s482_s1, 512 }
  0x15   :  { %s31_s30 = sshll.u32 %s360_s29, 4  ;;  %p262_p8 = scmp.ne.s32.totalorder %s482_s1, %s261_s7  ;;  %s32_s30 = int_to_ptr.vmem [resolvable:$true] %s31_s30 }
  0x16   :  { %p265_p9 = scmp.lt.u32.totalorder %s261_s7, %s482_s1 }
  0x18   :  { %p267_p10 = pnand %p265_p9, %p262_p8 }
  0x1a   :  { %270 = shalt.err (!%p267_p10)
}
  0x1b   :  { %s271_s12 = scalar_lea.vmem %s32_s30, 512  ;;  %p276_p12 = scmp.lt.s32.totalorder %s32_s30, %s32_s30 }
  0x1c   :  { %p272_p11 = scmp.ne.s32.totalorder %s32_s30, %s271_s12  ;;  %p277_p13 = scmp.lt.s32.totalorder %s271_s12, %s271_s12 }
  0x1e   :  { %p278_p0 = por %p277_p13, %p276_p12 }
  0x20   :  { %p279_p1 = pnand %p278_p0, %p272_p11 }
  0x22   :  { %282 = shalt.err (!%p279_p1)
}
  0x23   :  { %37 = dma.hbm_to_vmem [thread:$0]  %s482_s1, 512, %s32_s30, [#allocation6], %s358_s25, %s358_s25, %s359_s26  }
  0x24   :  { %349 = dma.done.wait [#allocation3], 256  }
  0x25   :  { %350 = vsyncadd [#allocation3], 4294967040 }
  0x26   :  { %351 = dma.done.wait [#allocation6], 512  }
  0x27   :  { %352 = vsyncadd [#allocation6], 4294966784  ;;  %vm50_vm0 = vcmask 261120   ;;  %v46_v0 = vld [vmem:[#allocation5] sm:$0xff]  ;;  %v47_v1 = vld [vmem:[#allocation5 + $0x8] sm:$0xff]  ;;  %s361_s1 = smov [#allocation7]  }
  0x28   :  { %v48_v2 = vld [vmem:[#allocation5 + $0x10] sm:$0xff]  ;;  %v222_v3 = vpack.c.bf16 %v47_v1, %v46_v0  ;;  %v49_v4 = vld [vmem:[#allocation5 + $0x18] sm:$0xff]  ;;  %s159_s14 = sshll.u32 %s361_s1, 4  ;;  %s362_s15 = smov 64   ;;  %s160_s14 = int_to_ptr.vmem [resolvable:$true] %s159_s14 }
  0x29   :  { %v44_v5 = vld [vmem:[#allocation2] sm:$0xff]  ;;  %v226_v6 = vpack.c.bf16 %v49_v4, %v48_v2  ;;  %v45_v7 = vld [vmem:[#allocation2 + $0x8] sm:$0xff]  ;;  %s363_s16 = smov 96   ;;  %s283_s17 = scalar_lea.vmem %s160_s14, 256 }
  0x2a   :  { %219 = vmatprep.mubr.msk.f32.mxu0 %vm50_vm0, %v44_v5  ;;  %223 = vmatprep.subr.bf16.mxu0 %v222_v3  ;;  %p284_p2 = scmp.ne.s32.totalorder %s160_s14, %s283_s17  ;;  %p288_p3 = scmp.lt.s32.totalorder %s160_s14, %s160_s14 }
  0x2b   :  { %225 = vmatpush3.bf16.msra.mxu0 %v222_v3  ;;  %p289_p4 = scmp.lt.s32.totalorder %s283_s17, %s283_s17 }
  0x2c   :  { %227 = vmatprep.subr.bf16.mxu0 %v226_v6 }
  0x2d   :  { %p290_p5 = por %p289_p4, %p288_p3 }
  0x2f   :  { %229 = vmatpush3.bf16.msra.mxu0 %v226_v6  ;;  %p291_p6 = pnand %p290_p5, %p284_p2 }
  0x32   :  { %220 = vmatmul.mubr.msk.f32.vlgmr.msra.gmra.mrb[0].mxu0 %vm50_vm0, %v45_v7 }
 0x105   :  { %v221_v8 = vpop.f32.mrb[0].mxu0 }
 0x106   :  { %v133_v9 = vmul.f32 0.35355338, %v221_v8  ;;  %v123_v10 = vpop.f32.mrb[1].mxu0 }
 0x107   :  { %v132_v11 = vmul.f32 0.35355338, %v123_v10  ;;  %146 = vrot.lane.b32.xlu1 %v123_v10, %s362_s15  ;;  %138 = vrot.lane.b32.xlu0 %v123_v10, %s363_s16 }
 0x108   :  { %135 = vst.msk [vmem:[#allocation7 + $0x8] sm:$0xff] %vm50_vm0, %v133_v9 }
 0x109   :  { %134 = vst.msk [vmem:[#allocation7] sm:$0xff] %vm50_vm0, %v132_v11 }
 0x10a   :  { %294 = shalt.err (!%p291_p6)
}
 0x10b   :  { %s295_s20 = scalar_lea.hbm %s483_s2, 256 }
 0x10c   :  { %p296_p7 = scmp.ne.s32.totalorder %s483_s2, %s295_s20  ;;  %p299_p8 = scmp.lt.u32.totalorder %s295_s20, %s483_s2 }
 0x10e   :  { %p301_p9 = pnand %p299_p8, %p296_p7 }
 0x110   :  { %304 = shalt.err (!%p301_p9)
}
 0x111   :  { %165 = dma.vmem_to_hbm [thread:$0]  %s160_s14, 256, %s483_s2, [#allocation4], %s358_s25, %s358_s25, %s359_s26  }
 0x112   :  { %148 = vrot.lane.b32.xlu1 %v221_v8, %s362_s15  ;;  %140 = vrot.lane.b32.xlu0 %v221_v8, %s363_s16  ;;  %s364_s29 = smov [#allocation8]   ;;  %s365_s5 = smov [#allocation10]  }
 0x113   :  { %s171_s30 = sshll.u32 %s364_s29, 4  ;;  %s183_s6 = sshll.u32 %s365_s5, 4  ;;  %s172_s30 = int_to_ptr.vmem [resolvable:$true] %s171_s30  ;;  %s442_s6 = int_to_ptr.vmem [resolvable:$true] %s183_s6 }
 0x114   :  { %s305_s2 = scalar_lea.vmem %s172_s30, 256  ;;  %p310_p11 = scmp.lt.s32.totalorder %s172_s30, %s172_s30 }
 0x115   :  { %p306_p10 = scmp.ne.s32.totalorder %s172_s30, %s305_s2  ;;  %p311_p12 = scmp.lt.s32.totalorder %s305_s2, %s305_s2 }
 0x117   :  { %p312_p13 = por %p311_p12, %p310_p11 }
 0x119   :  { %p313_p0 = pnand %p312_p13, %p306_p10 }
 0x179   :  { %v147_v12 = vpop.permute.xlu1 %146  ;;  %v139_v13 = vpop.permute.xlu0 %138 }
 0x17a   :  { %152 = vst.msk [vmem:[#allocation10] sm:$0xff] %vm50_vm0, %v147_v12  ;;  %144 = vst.msk [vmem:[#allocation8] sm:$0xff] %vm50_vm0, %v139_v13 }
 0x184   :  { %v149_v14 = vpop.permute.xlu1 %148  ;;  %v141_v15 = vpop.permute.xlu0 %140 }
 0x185   :  { %153 = vst.msk [vmem:[#allocation10 + $0x8] sm:$0xff] %vm50_vm0, %v149_v14  ;;  %145 = vst.msk [vmem:[#allocation8 + $0x8] sm:$0xff] %vm50_vm0, %v141_v15 }
 0x186   :  { %316 = shalt.err (!%p313_p0)
}
 0x187   :  { %s317_s9 = scalar_lea.hbm %s484_s3, 256 }
 0x188   :  { %p318_p1 = scmp.ne.s32.totalorder %s484_s3, %s317_s9  ;;  %p321_p2 = scmp.lt.u32.totalorder %s317_s9, %s484_s3 }
 0x18a   :  { %p323_p3 = pnand %p321_p2, %p318_p1 }
 0x18c   :  { %326 = shalt.err (!%p323_p3)
}
 0x18d   :  { %177 = dma.vmem_to_hbm [thread:$0]  %s172_s30, 256, %s484_s3, [#allocation9], %s358_s25, %s358_s25, %s359_s26  }
 0x18e   :  { %s327_s14 = scalar_lea.vmem %s442_s6, 256  ;;  %p332_p5 = scmp.lt.s32.totalorder %s442_s6, %s442_s6 }
 0x18f   :  { %p328_p4 = scmp.ne.s32.totalorder %s442_s6, %s327_s14  ;;  %p333_p6 = scmp.lt.s32.totalorder %s327_s14, %s327_s14 }
 0x191   :  { %p334_p7 = por %p333_p6, %p332_p5 }
 0x193   :  { %p335_p8 = pnand %p334_p7, %p328_p4 }
 0x195   :  { %338 = shalt.err (!%p335_p8)
}
 0x196   :  { %s339_s17 = scalar_lea.hbm %s485_s4, 256 }
 0x197   :  { %p340_p9 = scmp.ne.s32.totalorder %s485_s4, %s339_s17  ;;  %p343_p10 = scmp.lt.u32.totalorder %s339_s17, %s485_s4 }
 0x199   :  { %p345_p11 = pnand %p343_p10, %p340_p9 }
 0x19b   :  { %348 = shalt.err (!%p345_p11)
}
 0x19c   :  { %189 = dma.vmem_to_hbm [thread:$0]  %s442_s6, 256, %s485_s4, [#allocation9], %s358_s25, %s358_s25, %s359_s26  }
 0x19d   :  { %353 = dma.done.wait [#allocation4], 256  }
 0x19e   :  { %354 = vsyncadd [#allocation4], 4294967040 }
 0x19f   :  { %355 = dma.done.wait [#allocation9], 512  }
 0x1a0   :  { %356 = vsyncadd [#allocation9], 4294966784 }
 0x1a1   :  { %199 = vsyncpa [#allocation3], 1 }
 0x1a2   :  { %200 = vsyncpa [#allocation6], 1 }
 0x1a3   :  { %201 = vsyncpa [#allocation4], 1 }
 0x1a4   :  { %202 = vsyncpa [#allocation9], 1 }

</bundles_post_ra>
